<compile_context>
chip_gen: v7x
topology: tpu7x:2x2x1
jax: 0.10.0
libtpu: 0.0.40
codegen_flags: <defaults>
</compile_context>

<pallas_src>
import functools

import jax
import jax.numpy as jnp
import numpy as np
from jax import lax
from jax.experimental import pallas as pl
from jax.experimental.pallas import tpu as pltpu


def _round_up(n: int, m: int) -> int:
    return ((n + m - 1) // m) * m


def _pad_to(a, shape):
    return jnp.pad(a, [(0, t - s) for s, t in zip(a.shape, shape)])


# -----------------------------------------------------------------------------
# Pallas kernel: embeddings -> concat -> depth x Conv1d(k=3,p=1) -> Linear
# Grid iterates over batch tiles; each step handles batch_tile full sequences
# flattened into the matmul M dimension.
# -----------------------------------------------------------------------------
def _cnn_kernel(x_ref, y_ref,
                we1_ref, be1_ref, we2_ref, be2_ref,
                wconv_ref, bconv_ref,
                wlin_ref, blin_ref,
                out_ref,
                h_scr,
                *, depth: int, batch_tile: int, x_len: int, y_len: int,
                compute_dtype):
    Bt, Lx, Ly = batch_tile, x_len, y_len
    L = Lx + Ly
    M = Bt * L
    Dp = h_scr.shape[-1]
    c_in = x_ref.shape[-1]

    # ---- DataEmbedding (value projection), batch folded into M --------------
    x = x_ref[...].reshape(Bt * Lx, c_in).astype(compute_dtype)
    y = y_ref[...].reshape(Bt * Ly, c_in).astype(compute_dtype)
    xe = jnp.dot(x, we1_ref[...], preferred_element_type=jnp.float32) + be1_ref[...]
    ye = jnp.dot(y, we2_ref[...], preferred_element_type=jnp.float32) + be2_ref[...]

    # Assemble h = concat(x_emb, y_emb) per sequence directly in VMEM scratch.
    h_scr[:, :Lx, :] = xe.reshape(Bt, Lx, Dp)
    h_scr[:, Lx:, :] = ye.reshape(Bt, Ly, Dp)
    h = h_scr[...].reshape(M, Dp)                      # (Bt*L, Dp), seq-major

    # Per-sequence boundary masks, hoisted out of the depth loop.
    row = lax.broadcasted_iota(jnp.int32, (Bt, L, Dp), 1).reshape(M, Dp)
    mask_first = row == 0
    mask_last = row == L - 1

    # ---- Conv1d(k=3, pad=1) stack: one fused (M, 3Dp) x (3Dp, Dp) dot/layer --
    def conv_layer(h, w_cat, b):
        h_prev = jnp.where(mask_first, 0.0, pltpu.roll(h, shift=1, axis=0))
        h_next = jnp.where(mask_last, 0.0, pltpu.roll(h, shift=M - 1, axis=0))
        hcat = jnp.concatenate([h_prev, h, h_next], axis=-1).astype(compute_dtype)
        return jnp.dot(hcat, w_cat, preferred_element_type=jnp.float32) + b

    if depth <= 8:
        # Static unroll for small depth (scheduler visibility).
        for d in range(depth):
            h = conv_layer(h, wconv_ref[d], bconv_ref[d])
    else:
        # Bound live ranges / code size at large depth.
        h = lax.fori_loop(
            0, depth, lambda d, hc: conv_layer(hc, wconv_ref[d], bconv_ref[d]), h)

    # ---- Final Linear on the last y_len rows of each sequence only ----------
    h_tail = h.reshape(Bt, L, Dp)[:, Lx:, :].reshape(Bt * Ly, Dp)
    out = (jnp.dot(h_tail.astype(compute_dtype), wlin_ref[...],
                   preferred_element_type=jnp.float32)
           + blin_ref[...])
    out_ref[...] = out.reshape(Bt, Ly, -1).astype(out_ref.dtype)


def cnn_forward(x, y, params, *, depth: int, batch_tile=None,
                compute_dtype=jnp.float32, vmem_limit_bytes=None):
    """x: (B, Lx, c_in), y: (B, Ly, c_in) -> (B, Ly, c_out)."""
    B, Lx, c_in = x.shape
    _, Ly, _ = y.shape
    d_model = params["we1"].shape[1]
    c_out = params["wlin"].shape[1]
    L = Lx + Ly

    # Lane-dense padding of the model dims (zero pads keep padded channels 0).
    Dp = _round_up(d_model, 128)
    Cp = _round_up(c_out, 128)

    we1 = _pad_to(params["we1"], (c_in, Dp))
    be1 = _pad_to(params["be1"], (1, Dp))
    we2 = _pad_to(params["we2"], (c_in, Dp))
    be2 = _pad_to(params["be2"], (1, Dp))
    # (depth, 3, d, d) -> (depth, 3, Dp, Dp) -> (depth, 3*Dp, Dp); taps [-1,0,+1]
    wconv = _pad_to(params["wconv"], (depth, 3, Dp, Dp)).reshape(depth, 3 * Dp, Dp)
    bconv = _pad_to(params["bconv"], (depth, 1, Dp))
    wlin = _pad_to(params["wlin"], (Dp, Cp))
    blin = _pad_to(params["blin"], (1, Cp))

    if compute_dtype != jnp.float32:
        # bf16 MXU inputs (v6e/v7x); accumulation stays f32 in the kernel.
        we1, we2, wconv, wlin = (w.astype(compute_dtype)
                                 for w in (we1, we2, wconv, wlin))

    # Batch tiling: fold sequences into the matmul M dim; keep a "parallel"
    # grid axis over batch tiles (splits across v7x's two TensorCores).
    if batch_tile is None:
        batch_tile = int(max(1, min(B, 512 // L))) if L <= 512 else 1
    Bp = _round_up(B, batch_tile)
    if Bp != B:
        x = jnp.pad(x, ((0, Bp - B), (0, 0), (0, 0)))
        y = jnp.pad(y, ((0, Bp - B), (0, 0), (0, 0)))

    kernel = functools.partial(
        _cnn_kernel, depth=depth, batch_tile=batch_tile,
        x_len=Lx, y_len=Ly, compute_dtype=compute_dtype)

    rep = lambda shape: pl.BlockSpec(shape, lambda b: (0,) * len(shape))

    compiler_kwargs = dict(dimension_semantics=("parallel",))
    if vmem_limit_bytes is not None:
        compiler_kwargs["vmem_limit_bytes"] = vmem_limit_bytes

    out = pl.pallas_call(
        kernel,
        out_shape=jax.ShapeDtypeStruct((Bp, Ly, Cp), jnp.float32),
        grid_spec=pltpu.PrefetchScalarGridSpec(
            num_scalar_prefetch=0,
            grid=(Bp // batch_tile,),
            in_specs=[
                pl.BlockSpec((batch_tile, Lx, c_in), lambda b: (b, 0, 0)),
                pl.BlockSpec((batch_tile, Ly, c_in), lambda b: (b, 0, 0)),
                rep((c_in, Dp)),            # we1
                rep((1, Dp)),               # be1
                rep((c_in, Dp)),            # we2
                rep((1, Dp)),               # be2
                rep((depth, 3 * Dp, Dp)),   # fused conv weights (tap-major K)
                rep((depth, 1, Dp)),        # conv biases
                rep((Dp, Cp)),              # wlin
                rep((1, Cp)),               # blin
            ],
            out_specs=pl.BlockSpec((batch_tile, Ly, Cp), lambda b: (b, 0, 0)),
            scratch_shapes=[pltpu.VMEM((batch_tile, L, Dp), jnp.float32)],
        ),
        compiler_params=pltpu.CompilerParams(**compiler_kwargs),
    )(x, y, we1, be1, we2, be2, wconv, bconv, wlin, blin)

    # Slice off batch / lane padding (lane-dense kernel output, narrow result).
    return out[:B, :, :c_out]


# -----------------------------------------------------------------------------
# Pure-JAX reference (same semantics as the PyTorch forward) for validation.
# -----------------------------------------------------------------------------
def cnn_reference(x, y, params, *, depth: int):
    xe = x @ params["we1"] + params["be1"]
    ye = y @ params["we2"] + params["be2"]
    h = jnp.concatenate([xe, ye], axis=1)                     # (B, L, D)
    for d in range(depth):
        w = params["wconv"][d]                                # (3, D, D)
        b = params["bconv"][d]                                # (1, D)
        hp = jnp.pad(h, ((0, 0), (1, 1), (0, 0)))
        h = (hp[:, :-2] @ w[0] + hp[:, 1:-1] @ w[1] + hp[:, 2:] @ w[2] + b)
    out = h @ params["wlin"] + params["blin"]
    return out[:, -y.shape[1]:]


# -----------------------------------------------------------------------------
# Deterministic parameter init (synthetic, PyTorch-like uniform fan-in scaling).
# -----------------------------------------------------------------------------
def init_params(key, c_in, c_out, d_model, depth):
    ks = jax.random.split(key, 10)
    u = lambda k, shape, fan_in: jax.random.uniform(
        k, shape, jnp.float32, -1.0 / np.sqrt(fan_in), 1.0 / np.sqrt(fan_in))
    return {
        "we1": u(ks[0], (c_in, d_model), c_in),
        "be1": u(ks[1], (1, d_model), c_in),
        "we2": u(ks[2], (c_in, d_model), c_in),
        "be2": u(ks[3], (1, d_model), c_in),
        # conv weights stored as (depth, tap, d_in, d_out); tap order = [-1, 0, +1]
        "wconv": u(ks[4], (depth, 3, d_model, d_model), 3 * d_model),
        "bconv": u(ks[5], (depth, 1, d_model), 3 * d_model),
        "wlin": u(ks[6], (d_model, c_out), d_model),
        "blin": u(ks[7], (1, c_out), d_model),
    }


if __name__ == "__main__":
    # Small shapes consistent with the module's forward.
    B, Lx, Ly = 4, 8, 8
    c_in, c_out, d_model, depth = 4, 3, 32, 2

    key = jax.random.PRNGKey(0)
    kx, ky, kp = jax.random.split(key, 3)
    x = jax.random.normal(kx, (B, Lx, c_in), jnp.float32)   # batch['x']
    y = jax.random.normal(ky, (B, Ly, c_in), jnp.float32)   # batch['y']
    params = init_params(kp, c_in, c_out, d_model, depth)

    ref = cnn_reference(x, y, params, depth=depth)

    # f32 path (tight check); batch_tile=2 -> grid=(2,) "parallel",
    # 2 sequences folded into M per step (exercises per-sequence masks).
    out = cnn_forward(x, y, params, depth=depth, batch_tile=2)
    out = jax.block_until_ready(out)
    np.testing.assert_allclose(np.asarray(out), np.asarray(ref),
                               rtol=1e-4, atol=1e-5)
    assert out.shape == (B, Ly, c_out)

    # bf16 MXU-input path (v6e/v7x optimization), loose numerical check.
    out_bf16 = cnn_forward(x, y, params, depth=depth, batch_tile=2,
                           compute_dtype=jnp.bfloat16)
    out_bf16 = jax.block_until_ready(out_bf16)
    np.testing.assert_allclose(np.asarray(out_bf16), np.asarray(ref),
                               rtol=5e-2, atol=5e-2)

    print("KERNEL_OK")
</pallas_src>

<mosaic_0001>
module attributes {stable_mosaic.version = 11 : i64} {
  func.func @_cnn_kernel(%arg0: i32, %arg1: memref<2x8x4xf32, #tpu.memory_space<vmem>>, %arg2: memref<2x8x4xf32, #tpu.memory_space<vmem>>, %arg3: memref<4x128xf32, #tpu.memory_space<vmem>>, %arg4: memref<1x128xf32, #tpu.memory_space<vmem>>, %arg5: memref<4x128xf32, #tpu.memory_space<vmem>>, %arg6: memref<1x128xf32, #tpu.memory_space<vmem>>, %arg7: memref<2x384x128xf32, #tpu.memory_space<vmem>>, %arg8: memref<2x1x128xf32, #tpu.memory_space<vmem>>, %arg9: memref<128x128xf32, #tpu.memory_space<vmem>>, %arg10: memref<1x128xf32, #tpu.memory_space<vmem>>, %arg11: memref<2x8x128xf32, #tpu.memory_space<vmem>>, %arg12: memref<2x16x128xf32, #tpu.memory_space<vmem>>) attributes {dimension_semantics = [#tpu.dimension_semantics<parallel>], iteration_bounds = array<i64: 2>, scalar_prefetch = 0 : i64, scratch_operands = 1 : i64, tpu.core_type = #tpu.core_type<tc>, window_params = [{transform_indices = @transform_0, window_bounds = array<i64: 2, 8, 4>}, {transform_indices = @transform_1, window_bounds = array<i64: 2, 8, 4>}, {pipeline_mode = #tpu.pipeline_mode<synchronous>, transform_indices = @transform_2, window_bounds = array<i64: 4, 128>}, {pipeline_mode = #tpu.pipeline_mode<synchronous>, transform_indices = @transform_3, window_bounds = array<i64: 1, 128>}, {pipeline_mode = #tpu.pipeline_mode<synchronous>, transform_indices = @transform_4, window_bounds = array<i64: 4, 128>}, {pipeline_mode = #tpu.pipeline_mode<synchronous>, transform_indices = @transform_5, window_bounds = array<i64: 1, 128>}, {pipeline_mode = #tpu.pipeline_mode<synchronous>, transform_indices = @transform_6, window_bounds = array<i64: 2, 384, 128>}, {pipeline_mode = #tpu.pipeline_mode<synchronous>, transform_indices = @transform_7, window_bounds = array<i64: 2, 1, 128>}, {pipeline_mode = #tpu.pipeline_mode<synchronous>, transform_indices = @transform_8, window_bounds = array<i64: 128, 128>}, {pipeline_mode = #tpu.pipeline_mode<synchronous>, transform_indices = @transform_9, window_bounds = array<i64: 1, 128>}, {transform_indices = @transform_10, window_bounds = array<i64: 2, 8, 128>}]} {
    %c0 = arith.constant 0 : index
    %c0_0 = arith.constant 0 : index
    %c0_1 = arith.constant 0 : index
    %0 = vector.load %arg1[%c0, %c0_0, %c0_1] : memref<2x8x4xf32, #tpu.memory_space<vmem>>, vector<2x8x4xf32>
    %1 = vector.shape_cast %0 : vector<2x8x4xf32> to vector<16x4xf32>
    %c0_2 = arith.constant 0 : index
    %c0_3 = arith.constant 0 : index
    %c0_4 = arith.constant 0 : index
    %2 = vector.load %arg2[%c0_2, %c0_3, %c0_4] : memref<2x8x4xf32, #tpu.memory_space<vmem>>, vector<2x8x4xf32>
    %3 = vector.shape_cast %2 : vector<2x8x4xf32> to vector<16x4xf32>
    %c0_5 = arith.constant 0 : index
    %c0_6 = arith.constant 0 : index
    %4 = vector.load %arg3[%c0_5, %c0_6] : memref<4x128xf32, #tpu.memory_space<vmem>>, vector<4x128xf32>
    %cst = arith.constant dense<0.000000e+00> : vector<16x128xf32>
    %5 = tpu.matmul %1, %4, %cst {dimension_numbers = #tpu.dot_dimension_numbers<[1], [0], [0], [1], [0, 0, 1, 1], [], []>} : vector<16x4xf32>, vector<4x128xf32>, vector<16x128xf32> -> vector<16x128xf32>
    %c0_7 = arith.constant 0 : index
    %c0_8 = arith.constant 0 : index
    %6 = vector.load %arg4[%c0_7, %c0_8] : memref<1x128xf32, #tpu.memory_space<vmem>>, vector<1x128xf32>
    %7 = vector.broadcast %6 : vector<1x128xf32> to vector<16x128xf32>
    %8 = arith.addf %5, %7 : vector<16x128xf32>
    %c0_9 = arith.constant 0 : index
    %c0_10 = arith.constant 0 : index
    %9 = vector.load %arg5[%c0_9, %c0_10] : memref<4x128xf32, #tpu.memory_space<vmem>>, vector<4x128xf32>
    %cst_11 = arith.constant dense<0.000000e+00> : vector<16x128xf32>
    %10 = tpu.matmul %3, %9, %cst_11 {dimension_numbers = #tpu.dot_dimension_numbers<[1], [0], [0], [1], [0, 0, 1, 1], [], []>} : vector<16x4xf32>, vector<4x128xf32>, vector<16x128xf32> -> vector<16x128xf32>
    %c0_12 = arith.constant 0 : index
    %c0_13 = arith.constant 0 : index
    %11 = vector.load %arg6[%c0_12, %c0_13] : memref<1x128xf32, #tpu.memory_space<vmem>>, vector<1x128xf32>
    %12 = vector.broadcast %11 : vector<1x128xf32> to vector<16x128xf32>
    %13 = arith.addf %10, %12 : vector<16x128xf32>
    %14 = vector.shape_cast %8 : vector<16x128xf32> to vector<2x8x128xf32>
    %c0_14 = arith.constant 0 : index
    %c0_15 = arith.constant 0 : index
    %c0_16 = arith.constant 0 : index
    %15 = vector.load %arg12[%c0_14, %c0_15, %c0_16] : memref<2x16x128xf32, #tpu.memory_space<vmem>>, vector<2x8x128xf32>
    tpu.vector_store %arg12[%c0_14, %c0_15, %c0_16], %14 {strides = array<i32>} : memref<2x16x128xf32, #tpu.memory_space<vmem>>, vector<2x8x128xf32>,
    %16 = vector.shape_cast %13 : vector<16x128xf32> to vector<2x8x128xf32>
    %c0_17 = arith.constant 0 : index
    %c8 = arith.constant 8 : index
    %c0_18 = arith.constant 0 : index
    %17 = vector.load %arg12[%c0_17, %c8, %c0_18] : memref<2x16x128xf32, #tpu.memory_space<vmem>>, vector<2x8x128xf32>
    tpu.vector_store %arg12[%c0_17, %c8, %c0_18], %16 {strides = array<i32>} : memref<2x16x128xf32, #tpu.memory_space<vmem>>, vector<2x8x128xf32>,
    %c0_19 = arith.constant 0 : index
    %c0_20 = arith.constant 0 : index
    %c0_21 = arith.constant 0 : index
    %18 = vector.load %arg12[%c0_19, %c0_20, %c0_21] : memref<2x16x128xf32, #tpu.memory_space<vmem>>, vector<2x16x128xf32>
    %19 = vector.shape_cast %18 : vector<2x16x128xf32> to vector<32x128xf32>
    %20 = tpu.iota {dimensions = array<i32: 1>} : vector<2x16x128xi32>
    %21 = vector.shape_cast %20 : vector<2x16x128xi32> to vector<32x128xi32>
    %c0_i32 = arith.constant 0 : i32
    %22 = vector.broadcast %c0_i32 : i32 to vector<32x128xi32>
    %23 = arith.cmpi eq, %21, %22 : vector<32x128xi32>
    %c15_i32 = arith.constant 15 : i32
    %24 = vector.broadcast %c15_i32 : i32 to vector<32x128xi32>
    %25 = arith.cmpi eq, %21, %24 : vector<32x128xi32>
    %c0_22 = arith.constant 0 : index
    %c0_23 = arith.constant 0 : index
    %c0_24 = arith.constant 0 : index
    %26 = vector.load %arg7[%c0_22, %c0_23, %c0_24] : memref<2x384x128xf32, #tpu.memory_space<vmem>>, vector<1x384x128xf32>
    %27 = vector.shape_cast %26 : vector<1x384x128xf32> to vector<384x128xf32>
    %c0_25 = arith.constant 0 : index
    %c0_26 = arith.constant 0 : index
    %c0_27 = arith.constant 0 : index
    %28 = vector.load %arg8[%c0_25, %c0_26, %c0_27] : memref<2x1x128xf32, #tpu.memory_space<vmem>>, vector<1x1x128xf32>
    %29 = vector.shape_cast %28 : vector<1x1x128xf32> to vector<1x128xf32>
    %c1_i32 = arith.constant 1 : i32
    %30 = tpu.dynamic_rotate %19 by %c1_i32 dim 0 : vector<32x128xf32>, i32 -> vector<32x128xf32>
    %cst_28 = arith.constant 0.000000e+00 : f32
    %31 = vector.broadcast %cst_28 : f32 to vector<32x128xf32>
    %32 = arith.select %23, %31, %30 : vector<32x128xi1>, vector<32x128xf32>
    %c31_i32 = arith.constant 31 : i32
    %33 = tpu.dynamic_rotate %19 by %c31_i32 dim 0 : vector<32x128xf32>, i32 -> vector<32x128xf32>
    %cst_29 = arith.constant 0.000000e+00 : f32
    %34 = vector.broadcast %cst_29 : f32 to vector<32x128xf32>
    %35 = arith.select %25, %34, %33 : vector<32x128xi1>, vector<32x128xf32>
    %36 = tpu.concatenate %32, %19, %35 in 1 : vector<32x128xf32>, vector<32x128xf32>, vector<32x128xf32> -> vector<32x384xf32>
    %cst_30 = arith.constant dense<0.000000e+00> : vector<32x128xf32>
    %37 = tpu.matmul %36, %27, %cst_30 {dimension_numbers = #tpu.dot_dimension_numbers<[1], [0], [0], [1], [0, 0, 1, 1], [], []>} : vector<32x384xf32>, vector<384x128xf32>, vector<32x128xf32> -> vector<32x128xf32>
    %38 = vector.broadcast %29 : vector<1x128xf32> to vector<32x128xf32>
    %39 = arith.addf %37, %38 : vector<32x128xf32>
    %c1 = arith.constant 1 : index
    %c0_31 = arith.constant 0 : index
    %c0_32 = arith.constant 0 : index
    %40 = vector.load %arg7[%c1, %c0_31, %c0_32] : memref<2x384x128xf32, #tpu.memory_space<vmem>>, vector<1x384x128xf32>
    %41 = vector.shape_cast %40 : vector<1x384x128xf32> to vector<384x128xf32>
    %c1_33 = arith.constant 1 : index
    %c0_34 = arith.constant 0 : index
    %c0_35 = arith.constant 0 : index
    %42 = vector.load %arg8[%c1_33, %c0_34, %c0_35] : memref<2x1x128xf32, #tpu.memory_space<vmem>>, vector<1x1x128xf32>
    %43 = vector.shape_cast %42 : vector<1x1x128xf32> to vector<1x128xf32>
    %c1_i32_36 = arith.constant 1 : i32
    %44 = tpu.dynamic_rotate %39 by %c1_i32_36 dim 0 : vector<32x128xf32>, i32 -> vector<32x128xf32>
    %cst_37 = arith.constant 0.000000e+00 : f32
    %45 = vector.broadcast %cst_37 : f32 to vector<32x128xf32>
    %46 = arith.select %23, %45, %44 : vector<32x128xi1>, vector<32x128xf32>
    %c31_i32_38 = arith.constant 31 : i32
    %47 = tpu.dynamic_rotate %39 by %c31_i32_38 dim 0 : vector<32x128xf32>, i32 -> vector<32x128xf32>
    %cst_39 = arith.constant 0.000000e+00 : f32
    %48 = vector.broadcast %cst_39 : f32 to vector<32x128xf32>
    %49 = arith.select %25, %48, %47 : vector<32x128xi1>, vector<32x128xf32>
    %50 = tpu.concatenate %46, %39, %49 in 1 : vector<32x128xf32>, vector<32x128xf32>, vector<32x128xf32> -> vector<32x384xf32>
    %cst_40 = arith.constant dense<0.000000e+00> : vector<32x128xf32>
    %51 = tpu.matmul %50, %41, %cst_40 {dimension_numbers = #tpu.dot_dimension_numbers<[1], [0], [0], [1], [0, 0, 1, 1], [], []>} : vector<32x384xf32>, vector<384x128xf32>, vector<32x128xf32> -> vector<32x128xf32>
    %52 = vector.broadcast %43 : vector<1x128xf32> to vector<32x128xf32>
    %53 = arith.addf %51, %52 : vector<32x128xf32>
    %54 = vector.shape_cast %53 : vector<32x128xf32> to vector<2x16x128xf32>
    %55 = vector.extract_strided_slice %54 {offsets = [0, 8, 0], sizes = [2, 8, 128], strides = [1, 1, 1]} : vector<2x16x128xf32> to vector<2x8x128xf32>
    %56 = vector.shape_cast %55 : vector<2x8x128xf32> to vector<16x128xf32>
    %c0_41 = arith.constant 0 : index
    %c0_42 = arith.constant 0 : index
    %57 = vector.load %arg9[%c0_41, %c0_42] : memref<128x128xf32, #tpu.memory_space<vmem>>, vector<128x128xf32>
    %cst_43 = arith.constant dense<0.000000e+00> : vector<16x128xf32>
    %58 = tpu.matmul %56, %57, %cst_43 {dimension_numbers = #tpu.dot_dimension_numbers<[1], [0], [0], [1], [0, 0, 1, 1], [], []>} : vector<16x128xf32>, vector<128x128xf32>, vector<16x128xf32> -> vector<16x128xf32>
    %c0_44 = arith.constant 0 : index
    %c0_45 = arith.constant 0 : index
    %59 = vector.load %arg10[%c0_44, %c0_45] : memref<1x128xf32, #tpu.memory_space<vmem>>, vector<1x128xf32>
    %60 = vector.broadcast %59 : vector<1x128xf32> to vector<16x128xf32>
    %61 = arith.addf %58, %60 : vector<16x128xf32>
    %62 = vector.shape_cast %61 : vector<16x128xf32> to vector<2x8x128xf32>
    %c0_46 = arith.constant 0 : index
    %c0_47 = arith.constant 0 : index
    %c0_48 = arith.constant 0 : index
    %63 = vector.load %arg11[%c0_46, %c0_47, %c0_48] : memref<2x8x128xf32, #tpu.memory_space<vmem>>, vector<2x8x128xf32>
    tpu.vector_store %arg11[%c0_46, %c0_47, %c0_48], %62 {strides = array<i32>} : memref<2x8x128xf32, #tpu.memory_space<vmem>>, vector<2x8x128xf32>,
    return
  }
  func.func @transform_0(%arg0: i32) -> (i32, i32, i32) {
    %c0_i32 = arith.constant 0 : i32
    %c0_i32_0 = arith.constant 0 : i32
    %c0_i32_1 = arith.constant 0 : i32
    return %arg0, %c0_i32, %c0_i32_0 : i32, i32, i32
  }
  func.func @transform_1(%arg0: i32) -> (i32, i32, i32) {
    %c0_i32 = arith.constant 0 : i32
    %c0_i32_0 = arith.constant 0 : i32
    %c0_i32_1 = arith.constant 0 : i32
    return %arg0, %c0_i32, %c0_i32_0 : i32, i32, i32
  }
  func.func @transform_2(%arg0: i32) -> (i32, i32) {
    %c0_i32 = arith.constant 0 : i32
    %c0_i32_0 = arith.constant 0 : i32
    %c0_i32_1 = arith.constant 0 : i32
    return %c0_i32, %c0_i32_0 : i32, i32
  }
  func.func @transform_3(%arg0: i32) -> (i32, i32) {
    %c0_i32 = arith.constant 0 : i32
    %c0_i32_0 = arith.constant 0 : i32
    %c0_i32_1 = arith.constant 0 : i32
    return %c0_i32, %c0_i32_0 : i32, i32
  }
  func.func @transform_4(%arg0: i32) -> (i32, i32) {
    %c0_i32 = arith.constant 0 : i32
    %c0_i32_0 = arith.constant 0 : i32
    %c0_i32_1 = arith.constant 0 : i32
    return %c0_i32, %c0_i32_0 : i32, i32
  }
  func.func @transform_5(%arg0: i32) -> (i32, i32) {
    %c0_i32 = arith.constant 0 : i32
    %c0_i32_0 = arith.constant 0 : i32
    %c0_i32_1 = arith.constant 0 : i32
    return %c0_i32, %c0_i32_0 : i32, i32
  }
  func.func @transform_6(%arg0: i32) -> (i32, i32, i32) {
    %c0_i32 = arith.constant 0 : i32
    %c0_i32_0 = arith.constant 0 : i32
    %c0_i32_1 = arith.constant 0 : i32
    %c0_i32_2 = arith.constant 0 : i32
    return %c0_i32, %c0_i32_0, %c0_i32_1 : i32, i32, i32
  }
  func.func @transform_7(%arg0: i32) -> (i32, i32, i32) {
    %c0_i32 = arith.constant 0 : i32
    %c0_i32_0 = arith.constant 0 : i32
    %c0_i32_1 = arith.constant 0 : i32
    %c0_i32_2 = arith.constant 0 : i32
    return %c0_i32, %c0_i32_0, %c0_i32_1 : i32, i32, i32
  }
  func.func @transform_8(%arg0: i32) -> (i32, i32) {
    %c0_i32 = arith.constant 0 : i32
    %c0_i32_0 = arith.constant 0 : i32
    %c0_i32_1 = arith.constant 0 : i32
    return %c0_i32, %c0_i32_0 : i32, i32
  }
  func.func @transform_9(%arg0: i32) -> (i32, i32) {
    %c0_i32 = arith.constant 0 : i32
    %c0_i32_0 = arith.constant 0 : i32
    %c0_i32_1 = arith.constant 0 : i32
    return %c0_i32, %c0_i32_0 : i32, i32
  }
  func.func @transform_10(%arg0: i32) -> (i32, i32, i32) {
    %c0_i32 = arith.constant 0 : i32
    %c0_i32_0 = arith.constant 0 : i32
    %c0_i32_1 = arith.constant 0 : i32
    return %arg0, %c0_i32, %c0_i32_0 : i32, i32, i32
  }
}

</mosaic_0001>

<bundles_post_ra>
// kernel: tpu_custom_call.1
= control target key start
LH: loop header
LB: loop body
LE: loop exit
PB: predicated region body
PF: predicated region fallthrough
CT: control target
= control target key end

     0   :  { %15 = vsyncpa [#allocation4], 0  ;;  %s2325_s0 = inlined_call_operand.vmem [shape: f32[4,8,4], index: 0, kind: input, shape index: {}]   ;;  %s2326_s1 = inlined_call_operand.vmem [shape: f32[4,8,4], index: 1, kind: input, shape index: {}]   ;;  %s2327_s2 = inlined_call_operand.vmem [shape: f32[4,128], index: 2, kind: input, shape index: {}]   ;;  %s2328_s3 = inlined_call_operand.vmem [shape: f32[1,128], index: 3, kind: input, shape index: {}]   ;;  %s2329_s4 = inlined_call_operand.vmem [shape: f32[4,128], index: 4, kind: input, shape index: {}]   ;;  %s2330_s5 = inlined_call_operand.vmem [shape: f32[1,128], index: 5, kind: input, shape index: {}]   ;;  %s2331_s6 = inlined_call_operand.hbm [shape: f32[2,384,128], index: 6, kind: input, shape index: {}]   ;;  %s2332_s7 = inlined_call_operand.vmem [shape: f32[2,1,128], index: 7, kind: input, shape index: {}]   ;;  %s2333_s8 = inlined_call_operand.hbm [shape: f32[128,128], index: 8, kind: input, shape index: {}]   ;;  %s2334_s9 = inlined_call_operand.vmem [shape: f32[1,128], index: 9, kind: input, shape index: {}]   ;;  %s2335_s10 = inlined_call_operand.hbm [shape: f32[4,8,128], index: 10, kind: output, shape index: {}]  }
   0x1   :  { %16 = vsyncpa [#allocation7], 0 }
   0x2   :  { %17 = vsyncpa [#allocation5], 0 }
   0x3   :  { %19 = vsyncpa [#allocation5 + $0x1], 0  ;;  %s2062_s13 = smov 0   ;;  %s2064_s14 = smov 0  }
   0x4   :  { %s2066_s15 = smov 0   ;;  %s2068_s16 = smov 0  }
   0x5 LB: > { %2343 = sst [smem:[#allocation12_spill]] %s1994_s15  ;;  %s2083_s17 = sadd.s32 4294967295, %s1998_s16   ;;  %s1998_s16 = sphi %s2068_s16, %s2359_s16   ;;  %s1994_s15 = sphi %s2066_s15, %s2361_s15   ;;  %s1990_s14 = sphi %s2064_s14, %s2363_s14   ;;  %s1986_s13 = sphi %s2062_s13, %s2362_s13  }
   0x6   : > { %s1326_s18 = sadd.s32 4294967294, %s1998_s16   ;;  %s2087_s19 = sadd.s32 1, %s1998_s16  }
   0x7   : > { %2344 = sst [smem:[#allocation13_spill]] %s2087_s19  ;;  %s252_s20 = sadd.s32 1, %s1994_s15 }
   0x8   : > { %s249_s21 = ssub.s32 %s1998_s16, %s2087_s19  ;;  %p262_p0 = scmp.ne.s32.totalorder %s1994_s15, %s1990_s14 }
   0x9   : > { %p250_p1 = scmp.eq.s32.totalorder %s249_s21, 0  ;;  %p263_p2 = scmp.eq.s32.totalorder %s2083_s17, 1 }
   0xa   : > { %p268_p3 = scmp.ne.s32.totalorder %s1990_s14, %s1986_s13  ;;  %p269_p4 = scmp.eq.s32.totalorder %s1326_s18, 1 }
   0xb   : > { %s2098_s22 = scalar_select %p250_p1, %s1994_s15, %s252_s20  }
   0xc   : > { %p2100_p5 = por %p263_p2, %p262_p0  ;;  %p2104_p6 = por %p269_p4, %p268_p3 }
   0xd   : > { %2345 = sst [smem:[#allocation14_spill]] %s2098_s22  ;;  %p1327_p7 = scmp.ge.s32.totalorder %s1998_s16, 1 }
   0xe   : > { %s2346_s23 = scalar_select %p2100_p5, 1, 0 }
   0xf   : > { %s2347_s24 = scalar_select %p2104_p6, 1, 0 }
  0x10   : > { %p276_p8 = scmp.lt.s32.totalorder %s1998_s16, 3  ;;  %p2336_p9 = scmp.eq.s32.totalorder %s2083_s17, 0 }
  0x11   : > { %2348 = sst [smem:[#allocation15_spill]] %s2347_s24  ;;  %s2000_s26 = smov [#allocation3]  }
  0x12   : > { %p2111_p10 = pnand %p1327_p7, %p276_p8  ;;  %s300_s27 = sshll.u32 %s2000_s26, 4  ;;  %s301_s27 = int_to_ptr.vmem [resolvable:$true] %s300_s27 }
  0x13   : > { %s2001_s29 = smov [#allocation6]   ;;  %s1872_s18 = scalar_lea.hbm %s2331_s6, 12288 }
  0x14   : > { %s2349_s25 = scalar_select %p2111_p10, 1, 0 }
  0x15   : > { %p1818_p11 = pneg %p2111_p10  ;;  %s316_s30 = sshll.u32 %s2001_s29, 4  ;;  %s2123_s30 = int_to_ptr.vmem [resolvable:$true] %s316_s30 }
  0x16   : > { %p1873_p13 = scmp.ne.s32.totalorder %s2331_s6, %s1872_s18  ;;  %p1879_p3 = scmp.lt.u32.totalorder %s1872_s18, %s2331_s6 }
  0x17   : > { %p2119_p12 = pnand %p2336_p9, %p1818_p11 }
  0x19   : > { %p1874_p0 = pneg %p2119_p12 }
  0x1b   : > { %p1875_p1 = pnand %p1874_p0, %p1873_p13 }
  0x1d   : > { %p1876_p2 = pneg %p1875_p1 }
  0x1f   : > { %p1881_p4 = pnand %p1879_p3, %p1876_p2 }
  0x21   : > { %1884 = shalt.err (!%p1881_p4)
}
  0x22   : > { %s1885_s29 = scalar_lea.vmem %s301_s27, 12288  ;;  %p1893_p9 = scmp.lt.s32.totalorder %s301_s27, %s301_s27 }
  0x23   : > { %p1886_p7 = scmp.ne.s32.totalorder %s301_s27, %s1885_s29  ;;  %p1894_p6 = scmp.lt.s32.totalorder %s1885_s29, %s1885_s29 }
  0x25   : > { %p1888_p8 = pnand %p1886_p7, %p1874_p0  ;;  %p1895_p5 = por %p1894_p6, %p1893_p9 }
  0x27   : > { %p1889_p11 = pneg %p1888_p8 }
  0x29   : > { %p1896_p10 = pnand %p1895_p5, %p1889_p11 }
  0x2b   : > { %1899 = shalt.err (!%p1896_p10)
}
  0x2c   : > { %s2002_s11 = smov 128   ;;  %s2003_s12 = smov 8  }
  0x2d   : > { %1821 = dma.hbm_to_vmem [thread:$0]  (!%p2119_p12), %s2331_s6, 12288, %s301_s27, [#allocation4], %s2002_s11, %s2002_s11, %s2003_s12  }
  0x2e   : > { %s1900_s26 = scalar_lea.hbm %s2333_s8, 2048 }
  0x2f   : > { %p1901_p13 = scmp.ne.s32.totalorder %s2333_s8, %s1900_s26  ;;  %p1907_p9 = scmp.lt.u32.totalorder %s1900_s26, %s2333_s8 }
  0x31   : > { %p1903_p5 = pnand %p1901_p13, %p1874_p0 }
  0x33   : > { %p1904_p6 = pneg %p1903_p5 }
  0x35   : > { %p1909_p10 = pnand %p1907_p9, %p1904_p6 }
  0x37   : > { %1912 = shalt.err (!%p1909_p10)
}
  0x38   : > { %s1913_s27 = scalar_lea.vmem %s2123_s30, 2048  ;;  %p1921_p4 = scmp.lt.s32.totalorder %s2123_s30, %s2123_s30 }
  0x39   : > { %p1914_p1 = scmp.ne.s32.totalorder %s2123_s30, %s1913_s27  ;;  %p1922_p7 = scmp.lt.s32.totalorder %s1913_s27, %s1913_s27 }
  0x3b   : > { %p1916_p2 = pnand %p1914_p1, %p1874_p0  ;;  %p1923_p8 = por %p1922_p7, %p1921_p4 }
  0x3d   : > { %p1917_p3 = pneg %p1916_p2 }
  0x3f   : > { %p1924_p11 = pnand %p1923_p8, %p1917_p3 }
  0x41   : > { %1927 = shalt.err (!%p1924_p11)
}
  0x42   : > { %1824 = dma.hbm_to_vmem [thread:$0]  (!%p2119_p12), %s2333_s8, 2048, %s2123_s30, [#allocation7], %s2002_s11, %s2002_s11, %s2003_s12  }
  0x43   : > { %p2351_p13 = scmp.ne.s32.totalorder %s2349_s25, 0 }
  0x44   : > { %p2352_p5 = scmp.eq.s32.totalorder (!%p2351_p13), %s2083_s17, 0 }
  0x45   : > { %353 = sbr.rel (%p2351_p13) target bundleno = 1005 (0x3ed), region = 60 }
  0x4c   : > { %1973 = dma.done.wait (%p2352_p5), [#allocation4], 12288   ;;  %p2353_p0 = pmov %p2352_p5 }
  0x4e   : > { %1975 = vsyncadd (%p2353_p0), [#allocation4], 4294955008  ;;  %p2354_p6 = pmov %p2353_p0 }
  0x4f   : > { %p2355_p9 = pmov %p2353_p0 }
  0x50   : > { %1977 = dma.done.wait (%p2354_p6), [#allocation7], 2048  }
  0x51   : > { %1979 = vsyncadd (%p2355_p9), [#allocation7], 4294965248  ;;  %s1335_s24 = sshll.u32 %s2083_s17, 1  ;;  %vm432_vm0 = vcmask 1043456   ;;  %vm425_vm1 = vcmask 31744   ;;  %v634_v6 = vld [vmem:[#allocation3 + $0x80] sm:$0xff] }
  0x52   : > { %p401_p10 = scmp.lt.s32.totalorder %s1335_s24, 3  ;;  %v417_v0 = vld [vmem:[%s2327_s2] sm:$0xf]  ;;  %v635_v7 = vld [vmem:[#allocation3 + $0x88] sm:$0xff]  ;;  %v636_v15 = vld [vmem:[#allocation3 + $0x90] sm:$0xff]  ;;  %s397_s12 = sand.u32 1, %s1990_s14  }
  0x53   : > { %1527 = vmatprep.subr.msk.mxu1 %vm432_vm0, %v417_v0  ;;  %v511_v3 = vld [vmem:[%s2329_s4] sm:$0xf]  ;;  %v1648_v9 = vpack.c.bf16 %v635_v7, %v634_v6  ;;  %v619_v10 = vld [vmem:[#allocation3 + $0x8] sm:$0xff]  ;;  %v637_v16 = vld [vmem:[#allocation3 + $0x98] sm:$0xff]  ;;  %s1334_s22 = sshll.u32 %s397_s12, 4  ;;  %s1372_s29 = sshll.u32 %s2083_s17, 8 }
  0x54   : > { %s2365_s24 = smov (!%p401_p10, %s1335_s24), 3  ;;  %1528 = vmatpush3.msk.msra.mxu1 %vm432_vm0, %v417_v0  ;;  %v618_v8 = vld [vmem:[#allocation3] sm:$0xff]  ;;  %v651_v12 = vld [vmem:[#allocation3 + $0x108] sm:$0xff]  ;;  %v620_v17 = vld [vmem:[#allocation3 + $0x10] sm:$0xff]  ;;  %v1652_v18 = vpack.c.bf16 %v637_v16, %v636_v15  ;;  %s399_s21 = scalar_lea.vmem [#allocation8], %s1334_s22 }
  0x55   : > { %s1336_s28 = sshll.u32 %s2365_s24, 3  ;;  %1532 = vmatprep.subr.msk.mxu1 %vm432_vm0, %v511_v3  ;;  %v650_v11 = vld [vmem:[#allocation3 + $0x100] sm:$0xff]  ;;  %v1650_v13 = vpack.c.bf16 %v619_v10, %v618_v8  ;;  %1649 = vmatprep.subr.bf16.mxu0 %v1648_v9  ;;  %v621_v19 = vld [vmem:[#allocation3 + $0x18] sm:$0xff]  ;;  %v652_v20 = vld [vmem:[#allocation3 + $0x110] sm:$0xff]  ;;  %s1230_s26 = sshll.u32 %s399_s21, 4  ;;  %s2277_s26 = int_to_ptr.vmem [resolvable:$true] %s1230_s26 }
  0x56   : > { %s404_s11 = scalar_lea.vmem %s2325_s0, %s1336_s28  ;;  %s410_s18 = scalar_lea.vmem %s2326_s1, %s1336_s28  ;;  %v1680_v14 = vpack.c.bf16 %v651_v12, %v650_v11  ;;  %v653_v21 = vld [vmem:[#allocation3 + $0x118] sm:$0xff]  ;;  %v1654_v22 = vpack.c.bf16 %v621_v19, %v620_v17  ;;  %v638_v24 = vld [vmem:[#allocation3 + $0xa0] sm:$0xff]  ;;  %v639_v25 = vld [vmem:[#allocation3 + $0xa8] sm:$0xff] }
  0x57   : > { %v413_v1 = vld [vmem:[%s404_s11] sm:$0xff]  ;;  %v414_v2 = vld [vmem:[%s404_s11 + $0x8] sm:$0xff]  ;;  %1651 = vmatpush3.bf16.msra.mxu0 %v1650_v13  ;;  %v1684_v23 = vpack.c.bf16 %v653_v21, %v652_v20  ;;  %v1656_v27 = vpack.c.bf16 %v639_v25, %v638_v24  ;;  %v640_v31 = vld [vmem:[#allocation3 + $0xb0] sm:$0xff]  ;;  %v611_v20 = vlaneseq  ;;  %s2282_s19 = scalar_lea.hbm %s2335_s10, %s1372_s29  ;;  %s2284_s24 = scalar_lea.sflag [#allocation5], %s397_s12 }
  0x58   : > { %1529 = vmatprep.mubr.msk.f32.mxu1 %vm425_vm1, %v413_v1  ;;  %v415_v4 = vld [vmem:[%s410_s18] sm:$0xff]  ;;  %v416_v5 = vld [vmem:[%s410_s18 + $0x8] sm:$0xff]  ;;  %1653 = vmatprep.subr.bf16.mxu0 %v1652_v18  ;;  %v641_v32 = vld [vmem:[#allocation3 + $0xb8] sm:$0xff]  ;;  %s1928_s28 = scalar_lea.vmem %s2277_s26, 256  ;;  %p2356_p1 = scmp.ne.s32.totalorder %s2346_s23, 0 }
  0x59   : > { %1530 = vmatmul.mubr.msk.f32.vlgmr.msra.gmra.mrb[0].mxu1 %vm425_vm1, %v414_v2  ;;  %v622_v26 = vld [vmem:[#allocation3 + $0x20] sm:$0xff]  ;;  %v623_v28 = vld [vmem:[#allocation3 + $0x28] sm:$0xff]  ;;  %v656_v35 = vld [vmem:[#allocation3 + $0x130] sm:$0xff]  ;;  %v1660_v37 = vpack.c.bf16 %v641_v32, %v640_v31  ;;  %v2203_v21 = vshrl.u32 %v611_v20, 7  ;;  %p1929_p12 = scmp.ne.s32.totalorder %s2277_s26, %s1928_s28  ;;  %s2004_s17 = smov [#allocation8]  }
  0x5a   : > { %1533 = vmatpush3.msk.msra.mxu1 %vm432_vm0, %v511_v3  ;;  %1534 = vmatprep.mubr.msk.f32.mxu1 %vm425_vm1, %v415_v4  ;;  %v654_v29 = vld [vmem:[#allocation3 + $0x120] sm:$0xff]  ;;  %v655_v30 = vld [vmem:[#allocation3 + $0x128] sm:$0xff]  ;;  %v1658_v34 = vpack.c.bf16 %v623_v28, %v622_v26  ;;  %v657_v36 = vld [vmem:[#allocation3 + $0x138] sm:$0xff]  ;;  %s1932_s25 = sshll.u32 %s2004_s17, 4  ;;  %s1933_s25 = int_to_ptr.vmem [resolvable:$false] %s1932_s25 }
  0x5b   : > { %1681 = vmatprep.subr.bf16.mxu1 %v1680_v14  ;;  %v1688_v33 = vpack.c.bf16 %v655_v30, %v654_v29  ;;  %1655 = vmatpush3.bf16.msra.mxu0 %v1654_v22  ;;  %v624_v38 = vld [vmem:[#allocation3 + $0x30] sm:$0xff]  ;;  %v625_v39 = vld [vmem:[#allocation3 + $0x38] sm:$0xff]  ;;  %v642_v40 = vld [vmem:[#allocation3 + $0xc0] sm:$0xff]  ;;  %v1692_v42 = vpack.c.bf16 %v657_v36, %v656_v35  ;;  %v2212_v28 = vadd.s32 8, %v2203_v21  ;;  %vm671_vm2 = vcmp.lt.s32.totalorder %v2203_v21, 1  ;;  %p1930_p2 = pnand %p1929_p12, %p2356_p1  ;;  %s1934_s30 = scalar_lea.vmem %s1933_s25, 512 }
  0x5c   : > { %1657 = vmatprep.subr.bf16.mxu0 %v1656_v27  ;;  %v643_v41 = vld [vmem:[#allocation3 + $0xc8] sm:$0xff]  ;;  %v1662_v43 = vpack.c.bf16 %v625_v39, %v624_v38  ;;  %v658_v44 = vld [vmem:[#allocation3 + $0x140] sm:$0xff]  ;;  %v644_v49 = vld [vmem:[#allocation3 + $0xd0] sm:$0xff]  ;;  %vm1373_vm3 = vcmp.ne.s32.totalorder %v2203_v21, 0  ;;  %vm684_vm4 = vcmp.lt.s32.totalorder %v2203_v21, 7  ;;  %p1935_p4 = scmp.lt.s32.totalorder %s2277_s26, %s1933_s25  ;;  %p1936_p7 = scmp.lt.s32.totalorder %s1934_s30, %s1928_s28 }
  0x5d   : > { %1535 = vmatmul.mubr.msk.f32.vlgmr.msra.gmra.mrb[2].mxu1 %vm425_vm1, %v416_v5  ;;  %v659_v45 = vld [vmem:[#allocation3 + $0x148] sm:$0xff]  ;;  %v1664_v46 = vpack.c.bf16 %v643_v41, %v642_v40  ;;  %v626_v47 = vld [vmem:[#allocation3 + $0x40] sm:$0xff]  ;;  %v645_v50 = vld [vmem:[#allocation3 + $0xd8] sm:$0xff]  ;;  %vm1374_vm5 = vcmp.ne.s32.totalorder %v2212_v28, 15  ;;  %p1931_p3 = pneg %p1930_p2 }
  0x5e   : > { %1683 = vmatpush3.bf16.msra.mxu1 %v1680_v14  ;;  %v627_v48 = vld [vmem:[#allocation3 + $0x48] sm:$0xff]  ;;  %v1696_v51 = vpack.c.bf16 %v659_v45, %v658_v44  ;;  %v1668_v53 = vpack.c.bf16 %v645_v50, %v644_v49  ;;  %v628_v54 = vld [vmem:[#allocation3 + $0x50] sm:$0xff]  ;;  %v629_v55 = vld [vmem:[#allocation3 + $0x58] sm:$0xff]  ;;  %p1937_p8 = por %p1936_p7, %p1935_p4 }
  0x5f   : > { %1685 = vmatprep.subr.bf16.mxu1 %v1684_v23  ;;  %1659 = vmatpush3.bf16.msra.mxu0 %v1658_v34  ;;  %v1666_v52 = vpack.c.bf16 %v627_v48, %v626_v47  ;;  %v1670_v56 = vpack.c.bf16 %v629_v55, %v628_v54  ;;  %v660_v57 = vld [vmem:[#allocation3 + $0x150] sm:$0xff]  ;;  %v661_v58 = vld [vmem:[#allocation3 + $0x158] sm:$0xff]  ;;  %v646_v60 = vld [vmem:[#allocation3 + $0xe0] sm:$0xff] }
  0x60   : > { %1661 = vmatprep.subr.bf16.mxu0 %v1660_v37  ;;  %v1700_v59 = vpack.c.bf16 %v661_v58, %v660_v57  ;;  %v647_v61 = vld [vmem:[#allocation3 + $0xe8] sm:$0xff]  ;;  %v630_v63 = vld [vmem:[#allocation3 + $0x60] sm:$0xff]  ;;  %v648_v5 = vld [vmem:[#allocation3 + $0xf0] sm:$0xff]  ;;  %p1938_p11 = pnand %p1937_p8, %p1931_p3 }
  0x61   : > { %v1672_v62 = vpack.c.bf16 %v647_v61, %v646_v60  ;;  %v631_v0 = vld [vmem:[#allocation3 + $0x68] sm:$0xff]  ;;  %v662_v2 = vld [vmem:[#allocation3 + $0x160] sm:$0xff]  ;;  %v649_v6 = vld [vmem:[#allocation3 + $0xf8] sm:$0xff] }
  0x62   : > { %1687 = vmatpush3.bf16.msra.mxu1 %v1684_v23  ;;  %v1674_v1 = vpack.c.bf16 %v631_v0, %v630_v63  ;;  %v663_v3 = vld [vmem:[#allocation3 + $0x168] sm:$0xff]  ;;  %v1676_v7 = vpack.c.bf16 %v649_v6, %v648_v5  ;;  %v632_v8 = vld [vmem:[#allocation3 + $0x70] sm:$0xff]  ;;  %v633_v9 = vld [vmem:[#allocation3 + $0x78] sm:$0xff] }
  0x63   : > { %1689 = vmatprep.subr.bf16.mxu1 %v1688_v33  ;;  %1663 = vmatpush3.bf16.msra.mxu0 %v1662_v43  ;;  %v1704_v4 = vpack.c.bf16 %v663_v3, %v662_v2  ;;  %v1678_v10 = vpack.c.bf16 %v633_v9, %v632_v8  ;;  %v664_v11 = vld [vmem:[#allocation3 + $0x170] sm:$0xff]  ;;  %v665_v12 = vld [vmem:[#allocation3 + $0x178] sm:$0xff]  ;;  %v902_v14 = vld [vmem:[#allocation3 + $0x280] sm:$0xff] }
  0x64   : > { %1665 = vmatprep.subr.bf16.mxu0 %v1664_v46  ;;  %v1708_v13 = vpack.c.bf16 %v665_v12, %v664_v11  ;;  %v903_v15 = vld [vmem:[#allocation3 + $0x288] sm:$0xff]  ;;  %v886_v16 = vld [vmem:[#allocation3 + $0x200] sm:$0xff]  ;;  %v904_v30 = vld [vmem:[#allocation3 + $0x290] sm:$0xff] }
  0x65   : > { %v1744_v17 = vpack.c.bf16 %v903_v15, %v902_v14  ;;  %v887_v18 = vld [vmem:[#allocation3 + $0x208] sm:$0xff]  ;;  %v1339_v22 = vld [vmem:[%s2328_s3] ss:$0 sm:$0xff]  ;;  %v888_v47 = vld [vmem:[#allocation3 + $0x210] sm:$0xff] }
  0x66   : > { %1691 = vmatpush3.bf16.msra.mxu1 %v1688_v33  ;;  %v1712_v19 = vpack.c.bf16 %v887_v18, %v886_v16  ;;  %v1343_v27 = vld [vmem:[%s2330_s5] ss:$0 sm:$0xff]  ;;  %v905_v33 = vld [vmem:[#allocation3 + $0x298] sm:$0xff]  ;;  %v871_v35 = vld [vmem:[#allocation3 + $0x188] sm:$0xff] }
  0x67   : > { %1693 = vmatprep.subr.bf16.mxu1 %v1692_v42  ;;  %1667 = vmatpush3.bf16.msra.mxu0 %v1666_v52  ;;  %v870_v34 = vld [vmem:[#allocation3 + $0x180] sm:$0xff]  ;;  %v1748_v45 = vpack.c.bf16 %v905_v33, %v904_v30  ;;  %v889_v48 = vld [vmem:[#allocation3 + $0x218] sm:$0xff]  ;;  %v891_v60 = vld [vmem:[#allocation3 + $0x228] sm:$0xff] }
  0x68   : > { %1669 = vmatprep.subr.bf16.mxu0 %v1668_v53  ;;  %v1714_v46 = vpack.c.bf16 %v871_v35, %v870_v34  ;;  %v872_v53 = vld [vmem:[#allocation3 + $0x190] sm:$0xff]  ;;  %v873_v54 = vld [vmem:[#allocation3 + $0x198] sm:$0xff]  ;;  %v1716_v61 = vpack.c.bf16 %v889_v48, %v888_v47  ;;  %v907_v63 = vld [vmem:[#allocation3 + $0x2a8] sm:$0xff] }
  0x69   : > { %v1718_v0 = vpack.c.bf16 %v873_v54, %v872_v53  ;;  %v908_v3 = vld [vmem:[#allocation3 + $0x2b0] sm:$0xff]  ;;  %v874_v6 = vld [vmem:[#allocation3 + $0x1a0] sm:$0xff]  ;;  %v877_v15 = vld [vmem:[#allocation3 + $0x1b8] sm:$0xff] }
  0x6a   : > { %1695 = vmatpush3.bf16.msra.mxu1 %v1692_v42  ;;  %v892_v9 = vld [vmem:[#allocation3 + $0x230] sm:$0xff]  ;;  %v910_v11 = vld [vmem:[#allocation3 + $0x2c0] sm:$0xff]  ;;  %v897_v30 = vld [vmem:[#allocation3 + $0x258] sm:$0xff] }
  0x6b   : > { %1697 = vmatprep.subr.bf16.mxu1 %v1696_v51  ;;  %1671 = vmatpush3.bf16.msra.mxu0 %v1670_v56  ;;  %v876_v14 = vld [vmem:[#allocation3 + $0x1b0] sm:$0xff]  ;;  %v894_v18 = vld [vmem:[#allocation3 + $0x240] sm:$0xff]  ;;  %v915_v33 = vld [vmem:[#allocation3 + $0x2e8] sm:$0xff] }
  0x6c   : > { %1673 = vmatprep.subr.bf16.mxu0 %v1672_v62  ;;  %v906_v62 = vld [vmem:[#allocation3 + $0x2a0] sm:$0xff]  ;;  %v912_v20 = vld [vmem:[#allocation3 + $0x2d0] sm:$0xff]  ;;  %v881_v35 = vld [vmem:[#allocation3 + $0x1d8] sm:$0xff] }
  0x6d   : > { %v1752_v2 = vpack.c.bf16 %v907_v63, %v906_v62  ;;  %v880_v34 = vld [vmem:[#allocation3 + $0x1d0] sm:$0xff]  ;;  %v901_v48 = vld [vmem:[#allocation3 + $0x278] sm:$0xff]  ;;  %v1116_v53 = vld [vmem:[#allocation6] sm:$0xff] }
  0x6e   : > { %1699 = vmatpush3.bf16.msra.mxu1 %v1696_v51  ;;  %v900_v47 = vld [vmem:[#allocation3 + $0x270] sm:$0xff]  ;;  %v1117_v54 = vld [vmem:[#allocation6 + $0x8] sm:$0xff]  ;;  %v1124_v28 = vld [vmem:[#allocation6 + $0x40] sm:$0xff] }
  0x6f   : > { %1701 = vmatprep.subr.bf16.mxu1 %v1700_v59  ;;  %1675 = vmatpush3.bf16.msra.mxu0 %v1674_v1  ;;  %v1127_v21 = vld [vmem:[#allocation6 + $0x58] sm:$0xff] }
  0x70   : > { %1677 = vmatprep.subr.bf16.mxu0 %v1676_v7  ;;  %v875_v7 = vld [vmem:[#allocation3 + $0x1a8] sm:$0xff] }
  0x71   : > { %v1722_v8 = vpack.c.bf16 %v875_v7, %v874_v6 }
  0x72   : > { %1703 = vmatpush3.bf16.msra.mxu1 %v1700_v59  ;;  %v890_v59 = vld [vmem:[#allocation3 + $0x220] sm:$0xff] }
  0x73   : > { %1705 = vmatprep.subr.bf16.mxu1 %v1704_v4  ;;  %1679 = vmatpush3.bf16.msra.mxu0 %v1678_v10  ;;  %v1720_v1 = vpack.c.bf16 %v891_v60, %v890_v59  ;;  %v893_v10 = vld [vmem:[#allocation3 + $0x238] sm:$0xff] }
  0x74   : > { %1713 = vmatprep.subr.bf16.mxu0 %v1712_v19  ;;  %v1724_v12 = vpack.c.bf16 %v893_v10, %v892_v9  ;;  %v895_v19 = vld [vmem:[#allocation3 + $0x248] sm:$0xff] }
  0x76   : > { %1707 = vmatpush3.bf16.msra.mxu1 %v1704_v4  ;;  %v909_v4 = vld [vmem:[#allocation3 + $0x2b8] sm:$0xff] }
  0x77   : > { %1709 = vmatprep.subr.bf16.mxu1 %v1708_v13  ;;  %v1756_v5 = vpack.c.bf16 %v909_v4, %v908_v3 }
  0x7a   : > { %1711 = vmatpush3.bf16.msra.mxu1 %v1708_v13  ;;  %v911_v13 = vld [vmem:[#allocation3 + $0x2c8] sm:$0xff] }
  0x7b   : > { %1745 = vmatprep.subr.bf16.mxu1 %v1744_v17  ;;  %v1760_v16 = vpack.c.bf16 %v911_v13, %v910_v11 }
 0x12c   : > { %v1531_v23 = vpop.f32.mrb[0].mxu1 }
 0x12d   : > { %v502_v24 = vpop.f32.mrb[1].mxu1  ;;  %v508_v25 = vadd.f32 %v1531_v23, %v1339_v22  ;;  %v913_v23 = vld [vmem:[#allocation3 + $0x2d8] sm:$0xff] }
 0x12e   : > { %v503_v26 = vadd.f32 %v1339_v22, %v502_v24  ;;  %v1728_v22 = vpack.c.bf16 %v895_v19, %v894_v18  ;;  %v878_v24 = vld [vmem:[#allocation3 + $0x1c0] sm:$0xff] }
 0x12f   : > { %v669_v36 = vrot.slane %v508_v25, 7  ;;  %v682_v37 = vrot.slane %v508_v25, 1 }
 0x130   : > { %v1536_v29 = vpop.f32.mrb[2].mxu1  ;;  %763 = vmatprep.mubr.f32.mxu0 %v503_v26  ;;  %v667_v39 = vrot.slane %v503_v26, 7  ;;  %v680_v40 = vrot.slane %v503_v26, 1  ;;  %v1764_v26 = vpack.c.bf16 %v913_v23, %v912_v20 }
 0x131   : > { %v600_v31 = vadd.f32 %v1536_v29, %v1343_v27  ;;  %v594_v32 = vpop.f32.mrb[3].mxu1  ;;  %v896_v29 = vld [vmem:[#allocation3 + $0x250] sm:$0xff] }
 0x132   : > { %v595_v38 = vadd.f32 %v1343_v27, %v594_v32  ;;  %v1732_v32 = vpack.c.bf16 %v897_v30, %v896_v29  ;;  %v1118_v29 = vld [vmem:[#allocation6 + $0x10] sm:$0xff]  ;;  %v1119_v30 = vld [vmem:[#allocation6 + $0x18] sm:$0xff] }
 0x133   : > { %v670_v41 = vrot.slane %v600_v31, 7  ;;  %v683_v42 = vrot.slane %v600_v31, 1 }
 0x134   : > { %v668_v43 = vrot.slane %v595_v38, 7  ;;  %v681_v44 = vrot.slane %v595_v38, 1 }
 0x135   : > { %v675_v49 = vsel %vm671_vm2, %v670_v41, %v667_v39  ;;  %v685_v50 = vsel %vm684_vm4, %v682_v37, %v683_v42  ;;  %v688_v51 = vsel %vm684_vm4, %v683_v42, %v680_v40  ;;  %v672_v52 = vsel %vm671_vm2, %v669_v36, %v670_v41  ;;  %v917_v42 = vld [vmem:[#allocation3 + $0x2f8] sm:$0xff] }
 0x136   : > { %1349 = vmatmul.mubr.msk.f32.vlgmr.msra.gmra.mrb[0].mxu0 %vm1373_vm3, %v675_v49  ;;  %v687_v55 = vsel %vm684_vm4, %v680_v40, %v681_v44  ;;  %v686_v56 = vsel %vm684_vm4, %v681_v44, %v682_v37  ;;  %v674_v57 = vsel %vm671_vm2, %v667_v39, %v668_v43  ;;  %v673_v58 = vsel %vm671_vm2, %v668_v43, %v669_v36  ;;  %v899_v39 = vld [vmem:[#allocation3 + $0x268] sm:$0xff]  ;;  %v916_v40 = vld [vmem:[#allocation3 + $0x2f0] sm:$0xff]  ;;  %v882_v43 = vld [vmem:[#allocation3 + $0x1e0] sm:$0xff] }
 0x137   : > { %768 = vmatprep.mubr.f32.mxu0 %v595_v38  ;;  %1569 = vmatprep.mubr.f32.mxu1 %v687_v55  ;;  %v1734_v37 = vpack.c.bf16 %v881_v35, %v880_v34  ;;  %v898_v38 = vld [vmem:[#allocation3 + $0x260] sm:$0xff]  ;;  %v883_v44 = vld [vmem:[#allocation3 + $0x1e8] sm:$0xff]  ;;  %v1740_v49 = vpack.c.bf16 %v901_v48, %v900_v47  ;;  %v1776_v55 = vpack.c.bf16 %v1117_v54, %v1116_v53 }
 0x138   : > { %1570 = vmatmul.mubr.msk.f32.vlgmr.msra.gmra.mrb[4].mxu1 %vm1374_vm5, %v686_v56  ;;  %1715 = vmatpush3.bf16.msra.mxu0 %v1714_v46  ;;  %v1736_v41 = vpack.c.bf16 %v899_v39, %v898_v38  ;;  %v1738_v46 = vpack.c.bf16 %v883_v44, %v882_v43  ;;  %v1120_v38 = vld [vmem:[#allocation6 + $0x20] sm:$0xff]  ;;  %v1121_v39 = vld [vmem:[#allocation6 + $0x28] sm:$0xff] }
 0x139   : > { %1572 = vmatprep.mubr.f32.mxu1 %v685_v50  ;;  %1747 = vmatpush3.bf16.msra.mxu1 %v1744_v17  ;;  %v1726_v17 = vpack.c.bf16 %v877_v15, %v876_v14  ;;  %v884_v50 = vld [vmem:[#allocation3 + $0x1f0] sm:$0xff]  ;;  %v1125_v44 = vld [vmem:[#allocation6 + $0x48] sm:$0xff]  ;;  %v1128_v48 = vld [vmem:[#allocation6 + $0x60] sm:$0xff] }
 0x13a   : > { %769 = vmatmul.mubr.f32.gmra.mrb[2].mxu0 %v674_v57  ;;  %1749 = vmatprep.subr.bf16.mxu1 %v1748_v45 }
 0x13b   : > { %773 = vmatprep.mubr.f32.mxu0 %v508_v25  ;;  %1717 = vmatprep.subr.bf16.mxu0 %v1716_v61  ;;  %v879_v25 = vld [vmem:[#allocation3 + $0x1c8] sm:$0xff] }
 0x13c   : > { %1573 = vmatmul.mubr.msk.f32.gmra.mrb[6].mxu1 %vm1374_vm5, %v688_v51  ;;  %1719 = vmatpush3.bf16.msra.mxu0 %v1718_v0  ;;  %v1730_v27 = vpack.c.bf16 %v879_v25, %v878_v24  ;;  %v885_v51 = vld [vmem:[#allocation3 + $0x1f8] sm:$0xff] }
 0x13d   : > { %1751 = vmatpush3.bf16.msra.mxu1 %v1748_v45  ;;  %1721 = vmatprep.subr.bf16.mxu0 %v1720_v1  ;;  %v1772_v45 = vpack.c.bf16 %v917_v42, %v916_v40  ;;  %v1784_v40 = vpack.c.bf16 %v1121_v39, %v1120_v38  ;;  %v1123_v42 = vld [vmem:[#allocation6 + $0x38] sm:$0xff] }
 0x13e   : > { %1351 = vmatmul.mubr.msk.f32.gmra.mrb[4].mxu0 %vm1373_vm3, %v673_v58  ;;  %1753 = vmatprep.subr.bf16.mxu1 %v1752_v2  ;;  %v1347_v58 = vld [vmem:[%s2332_s7] ss:$0 sm:$0xff] }
 0x13f   : > { %778 = vmatprep.mubr.f32.mxu0 %v600_v31  ;;  %v914_v31 = vld [vmem:[#allocation3 + $0x2e0] sm:$0xff] }
 0x140   : > { %1723 = vmatpush3.bf16.msra.mxu0 %v1722_v8  ;;  %v1768_v36 = vpack.c.bf16 %v915_v33, %v914_v31  ;;  %v1780_v33 = vpack.c.bf16 %v1119_v30, %v1118_v29 }
 0x141   : > { %1755 = vmatpush3.bf16.msra.mxu1 %v1752_v2  ;;  %1725 = vmatprep.subr.bf16.mxu0 %v1724_v12 }
 0x142   : > { %779 = vmatmul.mubr.f32.gmra.mrb[6].mxu0 %v672_v52  ;;  %1757 = vmatprep.subr.bf16.mxu1 %v1756_v5  ;;  %v1742_v52 = vpack.c.bf16 %v885_v51, %v884_v50  ;;  %v1130_v51 = vld [vmem:[#allocation6 + $0x70] sm:$0xff] }
 0x144   : > { %1727 = vmatpush3.bf16.msra.mxu0 %v1726_v17 }
 0x145   : > { %1759 = vmatpush3.bf16.msra.mxu1 %v1756_v5  ;;  %1729 = vmatprep.subr.bf16.mxu0 %v1728_v22 }
 0x146   : > { %1761 = vmatprep.subr.bf16.mxu1 %v1760_v16 }
 0x148   : > { %1731 = vmatpush3.bf16.msra.mxu0 %v1730_v27 }
 0x149   : > { %1763 = vmatpush3.bf16.msra.mxu1 %v1760_v16  ;;  %1733 = vmatprep.subr.bf16.mxu0 %v1732_v32 }
 0x14a   : > { %1765 = vmatprep.subr.bf16.mxu1 %v1764_v26 }
 0x14c   : > { %1735 = vmatpush3.bf16.msra.mxu0 %v1734_v37 }
 0x14d   : > { %1767 = vmatpush3.bf16.msra.mxu1 %v1764_v26  ;;  %1737 = vmatprep.subr.bf16.mxu0 %v1736_v41  ;;  %v1122_v41 = vld [vmem:[#allocation6 + $0x30] sm:$0xff] }
 0x14e   : > { %1769 = vmatprep.subr.bf16.mxu1 %v1768_v36  ;;  %v1788_v43 = vpack.c.bf16 %v1123_v42, %v1122_v41 }
 0x150   : > { %1739 = vmatpush3.bf16.msra.mxu0 %v1738_v46  ;;  %v1126_v46 = vld [vmem:[#allocation6 + $0x50] sm:$0xff] }
 0x151   : > { %1771 = vmatpush3.bf16.msra.mxu1 %v1768_v36  ;;  %1741 = vmatprep.subr.bf16.mxu0 %v1740_v49  ;;  %v1796_v47 = vpack.c.bf16 %v1127_v21, %v1126_v46  ;;  %v1129_v49 = vld [vmem:[#allocation6 + $0x68] sm:$0xff] }
 0x152   : > { %1773 = vmatprep.subr.bf16.mxu1 %v1772_v45  ;;  %v1800_v50 = vpack.c.bf16 %v1129_v49, %v1128_v48 }
 0x154   : > { %1743 = vmatpush3.bf16.msra.mxu0 %v1742_v52  ;;  %v1131_v52 = vld [vmem:[#allocation6 + $0x78] sm:$0xff] }
 0x155   : > { %1775 = vmatpush3.bf16.msra.mxu1 %v1772_v45  ;;  %1777 = vmatprep.subr.bf16.mxu0 %v1776_v55  ;;  %v1792_v45 = vpack.c.bf16 %v1125_v44, %v1124_v28  ;;  %v1804_v53 = vpack.c.bf16 %v1131_v52, %v1130_v51 }
 0x209   : > { %v1413_v56 = vpop.f32.mrb[0].mxu0 }
 0x20a   : > { %v1414_v57 = vpop.f32.mrb[1].mxu0 }
 0x20b   : > { %v1415_v59 = vadd.f32 %v1414_v57, %v1413_v56  ;;  %v1571_v60 = vpop.f32.mrb[4].mxu1 }
 0x20c   : > { %v850_v61 = vpop.f32.mrb[5].mxu1 }
 0x20d   : > { %v766_v62 = vadd.f32 %v1415_v59, %v1347_v58  ;;  %v1416_v63 = vpop.f32.mrb[2].mxu0 }
 0x20e   : > { %v1417_v0 = vpop.f32.mrb[3].mxu0 }
 0x20f   : > { %v851_v1 = vadd.f32 %v850_v61, %v766_v62  ;;  %v1418_v2 = vadd.f32 %v1417_v0, %v1416_v63  ;;  %v1574_v3 = vpop.f32.mrb[6].mxu1  ;;  %v1357_v61 = vld [vmem:[%s2332_s7 + $0x1] ss:$0 sm:$0xff] }
 0x210   : > { %v860_v4 = vpop.f32.mrb[7].mxu1 }
 0x211   : > { %v771_v5 = vadd.f32 %v1418_v2, %v1347_v58  ;;  %v1419_v6 = vpop.f32.mrb[4].mxu0  ;;  %1014 = vmatprep.mubr.f32.mxu0 %v851_v1  ;;  %v920_v10 = vrot.slane %v851_v1, 7  ;;  %v932_v11 = vrot.slane %v851_v1, 1 }
 0x212   : > { %v1420_v7 = vpop.f32.mrb[5].mxu0 }
 0x213   : > { %v856_v8 = vadd.f32 %v1571_v60, %v771_v5  ;;  %v1421_v9 = vadd.f32 %v1420_v7, %v1419_v6 }
 0x215   : > { %v776_v12 = vadd.f32 %v1421_v9, %v1347_v58  ;;  %v1422_v13 = vpop.f32.mrb[6].mxu0  ;;  %v933_v14 = vrot.slane %v856_v8, 1  ;;  %v921_v15 = vrot.slane %v856_v8, 7  ;;  %v1366_v9 = vld [vmem:[%s2334_s9] ss:$0 sm:$0xff] }
 0x216   : > { %v1423_v16 = vpop.f32.mrb[7].mxu0 }
 0x217   : > { %v861_v17 = vadd.f32 %v860_v4, %v776_v12  ;;  %v1424_v18 = vadd.f32 %v1423_v16, %v1422_v13  ;;  %v938_v19 = vsel %vm684_vm4, %v932_v11, %v933_v14  ;;  %v926_v20 = vsel %vm671_vm2, %v920_v10, %v921_v15 }
 0x218   : > { %1607 = vmatprep.mubr.f32.mxu1 %v938_v19 }
 0x219   : > { %v934_v22 = vrot.slane %v861_v17, 1  ;;  %v781_v23 = vadd.f32 %v1424_v18, %v1347_v58  ;;  %v922_v24 = vrot.slane %v861_v17, 7 }
 0x21b   : > { %v866_v25 = vadd.f32 %v1574_v3, %v781_v23  ;;  %v937_v26 = vsel %vm684_vm4, %v933_v14, %v934_v22  ;;  %v925_v27 = vsel %vm671_vm2, %v921_v15, %v922_v24 }
 0x21c   : > { %1608 = vmatmul.mubr.msk.f32.vlgmr.msra.gmra.mrb[8].mxu1 %vm1374_vm5, %v937_v26 }
 0x21d   : > { %v923_v31 = vrot.slane %v866_v25, 7  ;;  %v935_v32 = vrot.slane %v866_v25, 1 }
 0x21f   : > { %v927_v34 = vsel %vm671_vm2, %v923_v31, %v920_v10  ;;  %v936_v35 = vsel %vm684_vm4, %v934_v22, %v935_v32  ;;  %v939_v36 = vsel %vm684_vm4, %v935_v32, %v932_v11  ;;  %v924_v37 = vsel %vm671_vm2, %v922_v24, %v923_v31 }
 0x220   : > { %1359 = vmatmul.mubr.msk.f32.vlgmr.msra.gmra.mrb[8].mxu0 %vm1373_vm3, %v927_v34  ;;  %1610 = vmatprep.mubr.f32.mxu1 %v936_v35 }
 0x221   : > { %1018 = vmatprep.mubr.f32.mxu0 %v856_v8  ;;  %1611 = vmatmul.mubr.msk.f32.gmra.mrb[10].mxu1 %vm1374_vm5, %v939_v36 }
 0x222   : > { %1779 = vmatpush3.bf16.msra.mxu0 %v1776_v55 }
 0x223   : > { %1781 = vmatprep.subr.bf16.mxu0 %v1780_v33 }
 0x224   : > { %1019 = vmatmul.mubr.f32.gmra.mrb[10].mxu0 %v926_v20 }
 0x225   : > { %1023 = vmatprep.mubr.f32.mxu0 %v861_v17 }
 0x226   : > { %1783 = vmatpush3.bf16.msra.mxu0 %v1780_v33 }
 0x227   : > { %1785 = vmatprep.subr.bf16.mxu0 %v1784_v40 }
 0x228   : > { %1361 = vmatmul.mubr.msk.f32.gmra.mrb[12].mxu0 %vm1373_vm3, %v925_v27 }
 0x229   : > { %1027 = vmatprep.mubr.f32.mxu0 %v866_v25 }
 0x22a   : > { %1787 = vmatpush3.bf16.msra.mxu0 %v1784_v40 }
 0x22b   : > { %1789 = vmatprep.subr.bf16.mxu0 %v1788_v43 }
 0x22c   : > { %1028 = vmatmul.mubr.f32.gmra.mrb[14].mxu0 %v924_v37 }
 0x22e   : > { %1791 = vmatpush3.bf16.msra.mxu0 %v1788_v43 }
 0x22f   : > { %1793 = vmatprep.subr.bf16.mxu0 %v1792_v45 }
 0x232   : > { %1795 = vmatpush3.bf16.msra.mxu0 %v1792_v45 }
 0x233   : > { %1797 = vmatprep.subr.bf16.mxu0 %v1796_v47 }
 0x236   : > { %1799 = vmatpush3.bf16.msra.mxu0 %v1796_v47 }
 0x237   : > { %1801 = vmatprep.subr.bf16.mxu0 %v1800_v50 }
 0x23a   : > { %1803 = vmatpush3.bf16.msra.mxu0 %v1800_v50 }
 0x23b   : > { %1805 = vmatprep.subr.bf16.mxu0 %v1804_v53 }
 0x23e   : > { %1807 = vmatpush3.bf16.msra.mxu0 %v1804_v53 }
 0x2ef   : > { %v1609_v54 = vpop.f32.mrb[8].mxu1 }
 0x2f0   : > { %v1099_v55 = vpop.f32.mrb[9].mxu1 }
 0x2f3   : > { %v1477_v56 = vpop.f32.mrb[8].mxu0 }
 0x2f4   : > { %v1478_v57 = vpop.f32.mrb[9].mxu0  ;;  %v1612_v58 = vpop.f32.mrb[10].mxu1 }
 0x2f5   : > { %v1108_v59 = vpop.f32.mrb[11].mxu1 }
 0x2f7   : > { %v1480_v60 = vpop.f32.mrb[10].mxu0 }
 0x2f8   : > { %v1481_v62 = vpop.f32.mrb[11].mxu0 }
 0x2f9   : > { %v1482_v63 = vadd.f32 %v1481_v62, %v1480_v60 }
 0x2fb   : > { %v1021_v0 = vadd.f32 %v1482_v63, %v1357_v61  ;;  %v1483_v1 = vpop.f32.mrb[12].mxu0 }
 0x2fc   : > { %v1484_v2 = vpop.f32.mrb[13].mxu0 }
 0x2fd   : > { %v1104_v3 = vadd.f32 %v1609_v54, %v1021_v0 }
 0x2ff   : > { %v1486_v4 = vpop.f32.mrb[14].mxu0  ;;  %1645 = vmatprep.mubr.f32.mxu0 %v1104_v3 }
 0x300   : > { %v1487_v5 = vpop.f32.mrb[15].mxu0 }
 0x301   : > { %v1488_v6 = vadd.f32 %v1487_v5, %v1486_v4 }
 0x303   : > { %v1030_v7 = vadd.f32 %v1488_v6, %v1357_v61 }
 0x305   : > { %v1113_v8 = vadd.f32 %v1612_v58, %v1030_v7 }
 0x307   : > { %1646 = vmatmul.mubr.f32.vlgmr.msra.gmra.mrb[16].mxu0 %v1113_v8 }
 0x3da   : > { %v1647_v10 = vpop.f32.mrb[16].mxu0 }
 0x3db   : > { %v1211_v11 = vadd.f32 %v1647_v10, %v1366_v9  ;;  %v1205_v12 = vpop.f32.mrb[17].mxu0 }
 0x3dc   : > { %v1206_v13 = vadd.f32 %v1366_v9, %v1205_v12 }
 0x3dd   : > { %1215 = vst [vmem:[%s399_s21 + $0x8] sm:$0xff] %v1211_v11 }
 0x3de   : > { %1214 = vst [vmem:[%s399_s21] sm:$0xff] %v1206_v13 }
 0x3df   : > { %1941 = shalt.err (!%p1938_p11)
}
 0x3e0   : > { %s1942_s11 = scalar_lea.hbm %s2282_s19, 256  ;;  %s1946_s18 = scalar_lea.hbm %s2335_s10, 512 }
 0x3e1   : > { %p1943_p13 = scmp.ne.s32.totalorder %s2282_s19, %s1942_s11  ;;  %p1947_p6 = scmp.lt.u32.totalorder %s2282_s19, %s2335_s10 }
 0x3e2   : > { %p1948_p9 = scmp.lt.u32.totalorder %s1946_s18, %s1942_s11  ;;  %p1950_p12 = scmp.lt.u32.totalorder %s1942_s11, %s2282_s19 }
 0x3e3   : > { %p1944_p5 = pnand %p1943_p13, %p2356_p1 }
 0x3e4   : > { %p1949_p10 = por %p1948_p9, %p1947_p6 }
 0x3e5   : > { %p1945_p0 = pneg %p1944_p5 }
 0x3e6   : > { %p1951_p2 = por %p1950_p12, %p1949_p10 }
 0x3e8   : > { %p1952_p3 = pnand %p1951_p2, %p1945_p0 }
 0x3ea   : > { %1955 = shalt.err (!%p1952_p3)
}
 0x3eb   : > { %s2005_s29 = smov 128   ;;  %s2006_s27 = smov 8  }
 0x3ec   : > { %1816 = dma.vmem_to_hbm [thread:$0]  (%p2356_p1), %s2277_s26, 256, %s2282_s19, %s2284_s24, %s2005_s29, %s2005_s29, %s2006_s27  }
 0x3ed PF: > { %s2357_s15 = sld [smem:[#allocation15_spill]]  ;;  %p1833_p4 = scmp.ge.s32.totalorder %s1998_s16, 2 }
 0x3ee   : > { %s1245_s28 = sand.u32 1, %s1986_s13  }
 0x3ef   : > { %s1246_s17 = scalar_lea.sflag [#allocation5], %s1245_s28 }
 0x3f3   : > { %p2358_p7 = scmp.ne.s32.totalorder %s2357_s15, 0 }
 0x3f5   : > { %p1826_p8 = pnand %p1833_p4, %p2358_p7 }
 0x3f7   : > { %1981 = dma.done.wait (!%p1826_p8), %s1246_s17, 256  }
 0x3f8   : > { %1983 = vsyncadd (!%p1826_p8), %s1246_s17, 4294967040  ;;  %s2359_s16 = sld [smem:[#allocation13_spill]]  ;;  %s2360_s25 = sld [smem:[#allocation12_spill]] }
 0x3f9   : > { %s2361_s15 = sld [smem:[#allocation14_spill]]  ;;  %s2362_s13 = smov %s1990_s14 }
 0x3fe   : > { %p22_p11 = scmp.ge.s32.totalorder %s2359_s16, 4   ;;  %s2363_s14 = smov %s2360_s25 }
 0x400   :  { %24 = sbr.rel (!%p22_p11) target bundleno = 5 (0x5), region = 109 }
 0x407   :  { %1251 = vsyncpa [#allocation4], 1 }
 0x408   :  { %1253 = vsyncpa [#allocation4 + $0x1], 1 }
 0x409   :  { %1254 = vsyncpa [#allocation7], 1 }
 0x40a   :  { %1255 = vsyncpa [#allocation5], 1 }
 0x40b   :  { %1257 = vsyncpa [#allocation5 + $0x1], 1 }

</bundles_post_ra>
